<compile_context>
chip_gen: v6e
topology: v6e:2x2x1
jax: 0.10.0
libtpu: 0.0.40
codegen_flags: <defaults>
</compile_context>

<pallas_src>
from functools import partial

import jax
import jax.numpy as jnp
from jax import lax
from jax.experimental import pallas as pl
from jax.experimental.pallas import tpu as pltpu

_LANES = 128

# ----------------------------------------------------------------------------
# Config logic (mirror of the PyTorch module's __init__) — plain Python glue.
# ----------------------------------------------------------------------------
_POW_DEFAULT_TABLE = {"ssim": 1, "mae": 2, "mse": 4}


def _check_metric_prediction_config(metric_type, metric_min, metric_max):
    if metric_type not in _POW_DEFAULT_TABLE:
        raise ValueError(f"metric_type={metric_type} not supported")
    if metric_min not in (-1, 0):
        raise ValueError(f"metric_min={metric_min} not supported")
    if metric_max <= metric_min:
        raise ValueError("metric_max must be > metric_min")


def _resolve_config(metric_type, metric_min, metric_max, pow_factor="default"):
    """Returns (activation_name, power) — both static Python values.

    `power` stays an int when integral so the kernel uses lax.integer_pow
    (chained VPU multiplies) instead of exp/log-based jnp.power.
    """
    _check_metric_prediction_config(metric_type, metric_min, metric_max)
    activation = "tanh" if metric_min == -1 else "sigmoid"

    if metric_min == 0:
        p = _POW_DEFAULT_TABLE[metric_type] if pow_factor == "default" else pow_factor
    else:
        p = 1

    if float(p) == float(int(p)):
        p = int(p)
    else:
        p = float(p)
    return activation, p


# ----------------------------------------------------------------------------
# Pallas kernel: elementwise activation + power on a VMEM tile.
# ----------------------------------------------------------------------------
def _regression_kernel(x_ref, o_ref, *, activation, power):
    x = x_ref[...].astype(jnp.float32)      # no-op for f32 inputs
    if activation == "tanh":
        y = jnp.tanh(x)                     # EUP
    else:
        y = jax.nn.sigmoid(x)               # EUP
    if isinstance(power, int):
        if power != 1:
            y = lax.integer_pow(y, power)   # VPU multiplies (free slot vs EUP)
    else:
        y = jnp.power(y, power)             # float-exponent fallback (rare)
    o_ref[...] = y.astype(o_ref.dtype)


# ----------------------------------------------------------------------------
# Generation-aware tiling heuristics.
# ----------------------------------------------------------------------------
def _num_tensorcores():
    """Best-effort count of TensorCores per JAX device (grid 'parallel' sharding)."""
    try:
        kind = jax.devices()[0].device_kind.lower()
    except Exception:  # pragma: no cover - defensive
        return 1
    # Dual-TC-per-device chips: v4 / v5p megacore, v7x-class.  v5e/v6e are 1 TC.
    return 2 if any(tag in kind for tag in ("v4", "v5p", "v7")) else 1


def _choose_block_rows(rows, dtype, num_tc):
    """Byte-based block sizing, aware of sublane packing and TC count."""
    itemsize = jnp.dtype(dtype).itemsize
    # Packed-sublane multiple: 8 (f32), 16 (bf16), 32 (int8/fp8).
    packing = 8 * max(1, 4 // max(itemsize, 1))
    # ~2 MiB of payload per block -> ~85% of HBM roofline for streaming adds,
    # while keeping (in + out) x double-buffer = 8 MiB << v7x scoped VMEM.
    target_bytes = 2 * 1024 * 1024
    cap_rows = max(packing, (target_bytes // (_LANES * itemsize)) // packing * packing)

    if rows > cap_rows:
        return cap_rows
    if num_tc >= 2 and rows >= 2 * packing:
        # Dual-TC chip: split into ~2 balanced, packing-aligned blocks so both
        # TensorCores stream the shared HBM.
        half = pl.cdiv(pl.cdiv(rows, 2), packing) * packing
        return min(half, rows)
    # Single-TC chip (v5e/v6e) or tiny input: one full-array block — no extra
    # per-step pipeline overhead (block_shape == full array dims is allowed).
    return rows


# ----------------------------------------------------------------------------
# pallas_call wrappers.
# ----------------------------------------------------------------------------
def _run_tiled(slab, activation, power, block_rows):
    rows = slab.shape[0]
    grid = (pl.cdiv(rows, block_rows),)
    return pl.pallas_call(
        partial(_regression_kernel, activation=activation, power=power),
        out_shape=jax.ShapeDtypeStruct(slab.shape, slab.dtype),
        grid_spec=pltpu.PrefetchScalarGridSpec(
            num_scalar_prefetch=0,
            grid=grid,
            in_specs=[pl.BlockSpec((block_rows, _LANES), lambda i: (i, 0))],
            out_specs=pl.BlockSpec((block_rows, _LANES), lambda i: (i, 0)),
        ),
        compiler_params=pltpu.CompilerParams(
            dimension_semantics=("parallel",),
        ),
        # TODO(synk): add input_output_aliases={0: 0} when callers can donate x.
    )(slab)


def _run_whole(arr2d, activation, power):
    # Single-invocation whole-array kernel (block == full array dims), used for
    # the <=127-element unaligned tail.
    return pl.pallas_call(
        partial(_regression_kernel, activation=activation, power=power),
        out_shape=jax.ShapeDtypeStruct(arr2d.shape, arr2d.dtype),
    )(arr2d)


def regression_layer(x, *, metric_type, metric_min, metric_max, pow_factor="default"):
    """Pallas equivalent of RegressionLayer.forward."""
    activation, power = _resolve_config(metric_type, metric_min, metric_max, pow_factor)

    orig_shape = x.shape
    dtype = x.dtype

    flat = x.reshape(-1)
    n = flat.shape[0]
    n_aligned = (n // _LANES) * _LANES
    rem = n - n_aligned
    num_tc = _num_tensorcores()

    body_out = None
    if n_aligned:
        rows = n_aligned // _LANES
        block_rows = _choose_block_rows(rows, dtype, num_tc)
        body = flat if rem == 0 else flat[:n_aligned]
        body_out = _run_tiled(body.reshape(rows, _LANES), activation, power, block_rows)

    if rem == 0:
        # Aligned fast path: pure metadata reshape, no extra HBM pass.
        return body_out.reshape(orig_shape)

    # Unaligned tail: tiny 1-block kernel, then a single assembly pass.
    tail_out = _run_whole(flat[n_aligned:].reshape(1, rem), activation, power).reshape(-1)
    if body_out is None:
        out_flat = tail_out
    else:
        out_flat = jnp.concatenate([body_out.reshape(-1), tail_out])
    return out_flat.reshape(orig_shape)


# ----------------------------------------------------------------------------
# Main
# ----------------------------------------------------------------------------
if __name__ == "__main__":
    key = jax.random.PRNGKey(0)
    x = jax.random.normal(key, (2, 4, 16, 16), dtype=jnp.float32)

    # Config 1: metric_type='mse', metric_min=0 -> sigmoid, then y**4.
    y_mse = regression_layer(x, metric_type="mse", metric_min=0, metric_max=1)
    y_mse = jax.block_until_ready(y_mse)
    s = jax.nn.sigmoid(x)
    ref_mse = s * s * s * s
    assert y_mse.shape == x.shape and y_mse.dtype == x.dtype
    assert jnp.allclose(y_mse, ref_mse, atol=1e-6, rtol=1e-6)

    # Config 2: metric_type='ssim', metric_min=-1 -> tanh, identity power.
    y_ssim = regression_layer(x, metric_type="ssim", metric_min=-1, metric_max=1)
    y_ssim = jax.block_until_ready(y_ssim)
    ref_ssim = jnp.tanh(x)
    assert jnp.allclose(y_ssim, ref_ssim, atol=1e-6, rtol=1e-6)

    # Config 3: unaligned element count exercises the prefix + tail path.
    x_odd = jax.random.normal(jax.random.PRNGKey(1), (3, 5, 7), dtype=jnp.float32)
    y_odd = regression_layer(x_odd, metric_type="mae", metric_min=0, metric_max=1)
    y_odd = jax.block_until_ready(y_odd)
    s_odd = jax.nn.sigmoid(x_odd)
    assert y_odd.shape == x_odd.shape
    assert jnp.allclose(y_odd, s_odd * s_odd, atol=1e-6, rtol=1e-6)

    # Config 4: unaligned with a non-empty aligned prefix (257 elements).
    x_mix = jax.random.normal(jax.random.PRNGKey(2), (257,), dtype=jnp.float32)
    y_mix = regression_layer(x_mix, metric_type="mse", metric_min=0, metric_max=1)
    y_mix = jax.block_until_ready(y_mix)
    s_mix = jax.nn.sigmoid(x_mix)
    assert jnp.allclose(y_mix, s_mix ** 4, atol=1e-6, rtol=1e-6)

    print("KERNEL_OK")
</pallas_src>

<mosaic_0001>
module attributes {stable_mosaic.version = 11 : i64} {
  func.func @_regression_kernel(%arg0: i32, %arg1: memref<16x128xf32, #tpu.memory_space<vmem>>, %arg2: memref<16x128xf32, #tpu.memory_space<vmem>>) attributes {dimension_semantics = [#tpu.dimension_semantics<parallel>], iteration_bounds = array<i64: 1>, scalar_prefetch = 0 : i64, scratch_operands = 0 : i64, tpu.core_type = #tpu.core_type<tc>, window_params = [{transform_indices = @transform_0, window_bounds = array<i64: 16, 128>}, {transform_indices = @transform_1, window_bounds = array<i64: 16, 128>}]} {
    %c0 = arith.constant 0 : index
    %c0_0 = arith.constant 0 : index
    %0 = vector.load %arg1[%c0, %c0_0] : memref<16x128xf32, #tpu.memory_space<vmem>>, vector<16x128xf32>
    %1 = arith.negf %0 : vector<16x128xf32>
    %2 = math.exp %1 : vector<16x128xf32>
    %cst = arith.constant 1.000000e+00 : f32
    %3 = vector.broadcast %cst : f32 to vector<16x128xf32>
    %4 = arith.addf %3, %2 : vector<16x128xf32>
    %5 = arith.divf %3, %4 : vector<16x128xf32>
    %6 = arith.mulf %5, %5 : vector<16x128xf32>
    %7 = arith.mulf %6, %6 : vector<16x128xf32>
    %c0_1 = arith.constant 0 : index
    %c0_2 = arith.constant 0 : index
    %8 = vector.load %arg2[%c0_1, %c0_2] : memref<16x128xf32, #tpu.memory_space<vmem>>, vector<16x128xf32>
    tpu.vector_store %arg2[%c0_1, %c0_2], %7 {strides = array<i32>} : memref<16x128xf32, #tpu.memory_space<vmem>>, vector<16x128xf32>,
    return
  }
  func.func @transform_0(%arg0: i32) -> (i32, i32) {
    %c0_i32 = arith.constant 0 : i32
    %c0_i32_0 = arith.constant 0 : i32
    return %arg0, %c0_i32 : i32, i32
  }
  func.func @transform_1(%arg0: i32) -> (i32, i32) {
    %c0_i32 = arith.constant 0 : i32
    %c0_i32_0 = arith.constant 0 : i32
    return %arg0, %c0_i32 : i32, i32
  }
}

</mosaic_0001>

<bundles_post_ra>
// kernel: tpu_custom_call.1
= control target key start
LH: loop header
LB: loop body
LE: loop exit
PB: predicated region body
PF: predicated region fallthrough
CT: control target
= control target key end

     0   :  { %6 = vsyncpa [#allocation3], 0  ;;  %s144_s0 = inlined_call_operand.hbm [shape: f32[16,128], index: 0, kind: input, shape index: {}]   ;;  %s145_s1 = inlined_call_operand.hbm [shape: f32[16,128], index: 1, kind: output, shape index: {}]  }
   0x1   :  { %7 = vsyncpa [#allocation4], 0  ;;  %s118_s6 = smov [#allocation2]  }
   0x2   :  { %s13_s7 = sshll.u32 %s118_s6, 4  ;;  %s14_s7 = int_to_ptr.vmem [resolvable:$true] %s13_s7 }
   0x3   :  { %s82_s8 = scalar_lea.vmem %s14_s7, 256  ;;  %p87_p1 = scmp.lt.s32.totalorder %s14_s7, %s14_s7 }
   0x4   :  { %p83_p0 = scmp.ne.s32.totalorder %s14_s7, %s82_s8  ;;  %p88_p2 = scmp.lt.s32.totalorder %s82_s8, %s82_s8 }
   0x6   :  { %p89_p3 = por %p88_p2, %p87_p1 }
   0x8   :  { %p90_p4 = pnand %p89_p3, %p83_p0 }
   0xa   :  { %93 = shalt.err (!%p90_p4)
}
   0xb   :  { %s119_s9 = smov 128   ;;  %s120_s10 = smov 8  }
   0xc   :  { %19 = dma.hbm_to_vmem [thread:$0]  %s144_s0, 256, %s14_s7, [#allocation3], %s119_s9, %s119_s9, %s120_s10  }
   0xd   :  { %114 = dma.done.wait [#allocation3], 256  }
   0xe   :  { %115 = vsyncadd [#allocation3], 4294967040  ;;  %v23_v0 = vld [vmem:[#allocation2] sm:$0xff]  ;;  %v24_v1 = vld [vmem:[#allocation2 + $0x8] sm:$0xff]  ;;  %s121_s13 = smov [#allocation5]  }
   0xf   :  { %v60_v2 = vmul.f32 -1.442695, %v23_v0  ;;  %v61_v3 = vmul.f32 -1.442695, %v24_v1  ;;  %s48_s14 = sshll.u32 %s121_s13, 4  ;;  %s49_s14 = int_to_ptr.vmem [resolvable:$true] %s48_s14 }
  0x10   :  { %s94_s0 = scalar_lea.vmem %s49_s14, 256  ;;  %p99_p6 = scmp.lt.s32.totalorder %s49_s14, %s49_s14 }
  0x11   :  { %66 = vpow2.f32 %v60_v2  ;;  %p95_p5 = scmp.ne.s32.totalorder %s49_s14, %s94_s0  ;;  %p100_p7 = scmp.lt.s32.totalorder %s94_s0, %s94_s0 }
  0x12   :  { %68 = vpow2.f32 %v61_v3 }
  0x13   :  { %p101_p8 = por %p100_p7, %p99_p6 }
  0x15   :  { %p102_p9 = pnand %p101_p8, %p95_p5 }
  0x1e   :  { %v67_v4 = vpop.eup %66 }
  0x1f   :  { %v69_v5 = vpop.eup %68  ;;  %v31_v6 = vadd.f32 1.0, %v67_v4 }
  0x20   :  { %v32_v7 = vadd.f32 1.0, %v69_v5 }
  0x21   :  { %70 = vrcp.f32 %v31_v6 }
  0x22   :  { %72 = vrcp.f32 %v32_v7 }
  0x2e   :  { %v71_v8 = vpop.eup %70 }
  0x2f   :  { %v73_v9 = vpop.eup %72  ;;  %v37_v10 = vmul.f32 %v71_v8, %v71_v8 }
  0x30   :  { %v38_v11 = vmul.f32 %v73_v9, %v73_v9 }
  0x31   :  { %v39_v12 = vmul.f32 %v37_v10, %v37_v10 }
  0x32   :  { %v40_v13 = vmul.f32 %v38_v11, %v38_v11 }
  0x33   :  { %41 = vst [vmem:[#allocation5] sm:$0xff] %v39_v12 }
  0x34   :  { %42 = vst [vmem:[#allocation5 + $0x8] sm:$0xff] %v40_v13 }
  0x35   :  { %105 = shalt.err (!%p102_p9)
}
  0x36   :  { %54 = dma.vmem_to_hbm [thread:$0]  %s49_s14, 256, %s145_s1, [#allocation4], %s119_s9, %s119_s9, %s120_s10  }
  0x37   :  { %116 = dma.done.wait [#allocation4], 256  }
  0x38   :  { %117 = vsyncadd [#allocation4], 4294967040 }
  0x39   :  { %58 = vsyncpa [#allocation3], 1 }
  0x3a   :  { %59 = vsyncpa [#allocation4], 1 }

</bundles_post_ra>
